<compile_context>
chip_gen: v7x
topology: tpu7x:2x2x1
jax: 0.10.0
libtpu: 0.0.40
codegen_flags: <defaults>
</compile_context>

<pallas_src>
import jax
import jax.numpy as jnp
from jax import lax
from jax.experimental import pallas as pl
from jax.experimental.pallas import tpu as pltpu


def _gdl_partial_kernel(pred_ref, target_ref, out_ref):
    # pred_ref / target_ref: (C, H, W) block for one batch element (batch squeezed).
    # out_ref: (1, 8, 128) lane-dense partial-sum block for this batch element.
    c, h, w = pred_ref.shape

    # Single upcast + single subtraction shared by all three difference maps.
    d = pred_ref[...].astype(jnp.float32) - target_ref[...].astype(jnp.float32)

    # Shifted copies via XLU rotations (positive shift of size-1 == roll by -1):
    #   d_right[:, y, x] == d[:, y, (x + 1) % w]   (lane rotate)
    #   d_down [:, y, x] == d[:, (y + 1) % h, x]   (sublane rotate)
    d_right = pltpu.roll(d, w - 1, axis=2)
    d_down = pltpu.roll(d, h - 1, axis=1)

    # Masks zeroing the wrap-around column / row (masked positions contribute 0).
    col = lax.broadcasted_iota(jnp.int32, (h, w), 1)
    row = lax.broadcasted_iota(jnp.int32, (h, w), 0)
    col_ok = col < (w - 1)
    row_ok = row < (h - 1)

    def masked_norm_sum(diff, valid):
        # L2 norm over the channel axis, mask invalid spatial positions, sum.
        sq = jnp.sum(diff * diff, axis=0)                 # (h, w)
        return jnp.sum(jnp.where(valid, jnp.sqrt(sq), 0.0))

    # Process the three terms sequentially into a scalar accumulator.
    total = masked_norm_sum(d_right - d, col_ok)                       # horizontal
    total = total + masked_norm_sum(d_down - d, row_ok)                # vertical
    total = total + masked_norm_sum(d_down - d_right, row_ok & col_ok)  # diagonal

    out_ref[...] = jnp.broadcast_to(total, out_ref.shape)


def supervised_loss(pred, target):
    assert pred.shape == target.shape
    n, c, h, w = pred.shape
    assert h == w, "reference torch.cat(dim=2) requires square spatial dims"

    # Per-batch input block is c*h*w elements; for realistic image sizes this is a
    # few MiB and auto-double-buffered by the BlockSpec pipeline.  Inputs are kept
    # in their native dtype (upcast happens inside the kernel).
    partial = pl.pallas_call(
        _gdl_partial_kernel,
        out_shape=jax.ShapeDtypeStruct((n, 8, 128), jnp.float32),
        grid=(n,),
        in_specs=[
            pl.BlockSpec((None, c, h, w), lambda i: (i, 0, 0, 0)),
            pl.BlockSpec((None, c, h, w), lambda i: (i, 0, 0, 0)),
        ],
        out_specs=pl.BlockSpec((1, 8, 128), lambda i: (i, 0, 0)),
        compiler_params=pltpu.CompilerParams(
            dimension_semantics=("parallel",),
        ),
    )(pred, target)

    # Tiny epilogue: combine per-batch partial sums and apply the exact divisor
    # N * (3S-1) * (S-1) (= element count of the reference's concatenated map).
    count = n * (3 * h - 1) * (w - 1)
    return jnp.sum(partial[:, 0, 0]) / jnp.float32(count)


def _reference(pred, target):
    # Faithful JAX port of the PyTorch forward (for verification).
    hor1 = pred[:, :, :, 1:] - pred[:, :, :, :-1]
    ver1 = jnp.transpose(pred[:, :, 1:, :] - pred[:, :, :-1, :], (0, 1, 3, 2))
    diag1 = pred[:, :, 1:, :-1] - pred[:, :, :-1, 1:]
    cat1 = jnp.concatenate((hor1, ver1, diag1), axis=2)
    hor2 = target[:, :, :, 1:] - target[:, :, :, :-1]
    ver2 = jnp.transpose(target[:, :, 1:, :] - target[:, :, :-1, :], (0, 1, 3, 2))
    diag2 = target[:, :, 1:, :-1] - target[:, :, :-1, 1:]
    cat2 = jnp.concatenate((hor2, ver2, diag2), axis=2)
    dis = cat1 - cat2
    return jnp.mean(jnp.sqrt(jnp.sum(dis * dis, axis=1)))


if __name__ == "__main__":
    key = jax.random.PRNGKey(0)
    k1, k2 = jax.random.split(key)
    N, C, S = 2, 4, 16
    pred = jax.random.normal(k1, (N, C, S, S), dtype=jnp.float32)
    target = jax.random.normal(k2, (N, C, S, S), dtype=jnp.float32)

    loss = supervised_loss(pred, target)
    jax.block_until_ready(loss)

    ref = _reference(pred, target)
    assert jnp.allclose(loss, ref, rtol=1e-5, atol=1e-5), (float(loss), float(ref))
    print("KERNEL_OK")
</pallas_src>

<mosaic_0001>
module attributes {stable_mosaic.version = 11 : i64} {
  func.func @_gdl_partial_kernel(%arg0: i32, %arg1: memref<1x4x16x16xf32, #tpu.memory_space<vmem>>, %arg2: memref<1x4x16x16xf32, #tpu.memory_space<vmem>>, %arg3: memref<1x8x128xf32, #tpu.memory_space<vmem>>) attributes {dimension_semantics = [#tpu.dimension_semantics<parallel>], iteration_bounds = array<i64: 2>, scalar_prefetch = 0 : i64, scratch_operands = 0 : i64, tpu.core_type = #tpu.core_type<tc>, window_params = [{transform_indices = @transform_0, window_bounds = array<i64: 1, 4, 16, 16>}, {transform_indices = @transform_1, window_bounds = array<i64: 1, 4, 16, 16>}, {transform_indices = @transform_2, window_bounds = array<i64: 1, 8, 128>}]} {
    %c0 = arith.constant 0 : index
    %c0_0 = arith.constant 0 : index
    %c0_1 = arith.constant 0 : index
    %c0_2 = arith.constant 0 : index
    %0 = vector.load %arg1[%c0, %c0_0, %c0_1, %c0_2] : memref<1x4x16x16xf32, #tpu.memory_space<vmem>>, vector<1x4x16x16xf32>
    %1 = vector.shape_cast %0 : vector<1x4x16x16xf32> to vector<4x16x16xf32>
    %c0_3 = arith.constant 0 : index
    %c0_4 = arith.constant 0 : index
    %c0_5 = arith.constant 0 : index
    %c0_6 = arith.constant 0 : index
    %2 = vector.load %arg2[%c0_3, %c0_4, %c0_5, %c0_6] : memref<1x4x16x16xf32, #tpu.memory_space<vmem>>, vector<1x4x16x16xf32>
    %3 = vector.shape_cast %2 : vector<1x4x16x16xf32> to vector<4x16x16xf32>
    %4 = arith.subf %1, %3 : vector<4x16x16xf32>
    %c15_i32 = arith.constant 15 : i32
    %5 = tpu.dynamic_rotate %4 by %c15_i32 dim 2 : vector<4x16x16xf32>, i32 -> vector<4x16x16xf32>
    %c15_i32_7 = arith.constant 15 : i32
    %6 = tpu.dynamic_rotate %4 by %c15_i32_7 dim 1 : vector<4x16x16xf32>, i32 -> vector<4x16x16xf32>
    %7 = tpu.iota {dimensions = array<i32: 1>} : vector<16x16xi32>
    %8 = tpu.iota {dimensions = array<i32: 0>} : vector<16x16xi32>
    %c15_i32_8 = arith.constant 15 : i32
    %9 = vector.broadcast %c15_i32_8 : i32 to vector<16x16xi32>
    %10 = arith.cmpi slt, %7, %9 : vector<16x16xi32>
    %c15_i32_9 = arith.constant 15 : i32
    %11 = vector.broadcast %c15_i32_9 : i32 to vector<16x16xi32>
    %12 = arith.cmpi slt, %8, %11 : vector<16x16xi32>
    %13 = arith.subf %5, %4 : vector<4x16x16xf32>
    %14 = arith.mulf %13, %13 : vector<4x16x16xf32>
    %cst = arith.constant dense<0.000000e+00> : vector<16x16xf32>
    %15 = vector.multi_reduction <add>, %14, %cst [0] : vector<4x16x16xf32> to vector<16x16xf32>
    %16 = math.sqrt %15 : vector<16x16xf32>
    %cst_10 = arith.constant 0.000000e+00 : f32
    %17 = vector.broadcast %cst_10 : f32 to vector<16x16xf32>
    %18 = arith.select %10, %16, %17 : vector<16x16xi1>, vector<16x16xf32>
    %19 = vector.shape_cast %18 : vector<16x16xf32> to vector<1x16x16xf32>
    %cst_11 = arith.constant dense<0.000000e+00> : vector<1xf32>
    %20 = vector.multi_reduction <add>, %19, %cst_11 [1, 2] : vector<1x16x16xf32> to vector<1xf32>
    %21 = vector.shape_cast %20 : vector<1xf32> to vector<1x1x1xf32>
    %22 = vector.extract %21[0, 0, 0] : f32 from vector<1x1x1xf32>
    %23 = arith.subf %6, %4 : vector<4x16x16xf32>
    %24 = arith.mulf %23, %23 : vector<4x16x16xf32>
    %cst_12 = arith.constant dense<0.000000e+00> : vector<16x16xf32>
    %25 = vector.multi_reduction <add>, %24, %cst_12 [0] : vector<4x16x16xf32> to vector<16x16xf32>
    %26 = math.sqrt %25 : vector<16x16xf32>
    %cst_13 = arith.constant 0.000000e+00 : f32
    %27 = vector.broadcast %cst_13 : f32 to vector<16x16xf32>
    %28 = arith.select %12, %26, %27 : vector<16x16xi1>, vector<16x16xf32>
    %29 = vector.shape_cast %28 : vector<16x16xf32> to vector<1x16x16xf32>
    %cst_14 = arith.constant dense<0.000000e+00> : vector<1xf32>
    %30 = vector.multi_reduction <add>, %29, %cst_14 [1, 2] : vector<1x16x16xf32> to vector<1xf32>
    %31 = vector.shape_cast %30 : vector<1xf32> to vector<1x1x1xf32>
    %32 = vector.extract %31[0, 0, 0] : f32 from vector<1x1x1xf32>
    %33 = arith.addf %22, %32 : f32
    %34 = arith.subf %6, %5 : vector<4x16x16xf32>
    %35 = arith.andi %12, %10 : vector<16x16xi1>
    %36 = arith.mulf %34, %34 : vector<4x16x16xf32>
    %cst_15 = arith.constant dense<0.000000e+00> : vector<16x16xf32>
    %37 = vector.multi_reduction <add>, %36, %cst_15 [0] : vector<4x16x16xf32> to vector<16x16xf32>
    %38 = math.sqrt %37 : vector<16x16xf32>
    %cst_16 = arith.constant 0.000000e+00 : f32
    %39 = vector.broadcast %cst_16 : f32 to vector<16x16xf32>
    %40 = arith.select %35, %38, %39 : vector<16x16xi1>, vector<16x16xf32>
    %41 = vector.shape_cast %40 : vector<16x16xf32> to vector<1x16x16xf32>
    %cst_17 = arith.constant dense<0.000000e+00> : vector<1xf32>
    %42 = vector.multi_reduction <add>, %41, %cst_17 [1, 2] : vector<1x16x16xf32> to vector<1xf32>
    %43 = vector.shape_cast %42 : vector<1xf32> to vector<1x1x1xf32>
    %44 = vector.extract %43[0, 0, 0] : f32 from vector<1x1x1xf32>
    %45 = arith.addf %33, %44 : f32
    %46 = vector.broadcast %45 : f32 to vector<1x8x128xf32>
    %c0_18 = arith.constant 0 : index
    %c0_19 = arith.constant 0 : index
    %c0_20 = arith.constant 0 : index
    %47 = vector.load %arg3[%c0_18, %c0_19, %c0_20] : memref<1x8x128xf32, #tpu.memory_space<vmem>>, vector<1x8x128xf32>
    tpu.vector_store %arg3[%c0_18, %c0_19, %c0_20], %46 {strides = array<i32>} : memref<1x8x128xf32, #tpu.memory_space<vmem>>, vector<1x8x128xf32>,
    return
  }
  func.func @transform_0(%arg0: i32) -> (i32, i32, i32, i32) {
    %c0_i32 = arith.constant 0 : i32
    %c0_i32_0 = arith.constant 0 : i32
    %c0_i32_1 = arith.constant 0 : i32
    %c0_i32_2 = arith.constant 0 : i32
    return %arg0, %c0_i32, %c0_i32_0, %c0_i32_1 : i32, i32, i32, i32
  }
  func.func @transform_1(%arg0: i32) -> (i32, i32, i32, i32) {
    %c0_i32 = arith.constant 0 : i32
    %c0_i32_0 = arith.constant 0 : i32
    %c0_i32_1 = arith.constant 0 : i32
    %c0_i32_2 = arith.constant 0 : i32
    return %arg0, %c0_i32, %c0_i32_0, %c0_i32_1 : i32, i32, i32, i32
  }
  func.func @transform_2(%arg0: i32) -> (i32, i32, i32) {
    %c0_i32 = arith.constant 0 : i32
    %c0_i32_0 = arith.constant 0 : i32
    %c0_i32_1 = arith.constant 0 : i32
    return %arg0, %c0_i32, %c0_i32_0 : i32, i32, i32
  }
}

</mosaic_0001>

<bundles_post_ra>
// kernel: tpu_custom_call.1
= control target key start
LH: loop header
LB: loop body
LE: loop exit
PB: predicated region body
PF: predicated region fallthrough
CT: control target
= control target key end

     0   :  { %7 = vsyncpa [#allocation3], 0  ;;  %s1346_s0 = inlined_call_operand.hbm [shape: f32[2,4,16,16], index: 0, kind: input, shape index: {}]   ;;  %s1347_s1 = inlined_call_operand.hbm [shape: f32[2,4,16,16], index: 1, kind: input, shape index: {}]   ;;  %s1348_s2 = inlined_call_operand.hbm [shape: f32[2,8,128], index: 2, kind: output, shape index: {}]  }
   0x1   :  { %9 = vsyncpa [#allocation3 + $0x1], 0 }
   0x2   :  { %10 = vsyncpa [#allocation6], 0 }
   0x3   :  { %12 = vsyncpa [#allocation6 + $0x1], 0 }
   0x4   :  { %13 = vsyncpa [#allocation4], 0 }
   0x5   :  { %15 = vsyncpa [#allocation4 + $0x1], 0  ;;  %s909_s9 = smov 0   ;;  %s911_s10 = smov 0  }
   0x6   :  { %s913_s11 = smov 0   ;;  %s915_s12 = smov 0  }
   0x7 LB: > { %s930_s13 = sadd.s32 4294967295, %s884_s12   ;;  %s661_s14 = sadd.s32 4294967294, %s884_s12   ;;  %s884_s12 = sphi %s915_s12, %s1364_s12   ;;  %s880_s11 = sphi %s913_s11, %s1363_s11   ;;  %s876_s10 = sphi %s911_s10, %s1362_s10   ;;  %s872_s9 = sphi %s909_s9, %s1361_s9  }
   0x8   : > { %s934_s15 = sadd.s32 1, %s884_s12   ;;  %s28_s16 = sadd.s32 1, %s880_s11 }
   0x9   : > { %s25_s17 = ssub.s32 %s884_s12, %s934_s15  ;;  %p35_p0 = scmp.ne.s32.totalorder %s880_s11, %s876_s10 }
   0xa   : > { %p26_p1 = scmp.eq.s32.totalorder %s25_s17, 0  ;;  %p36_p2 = scmp.eq.s32.totalorder %s884_s12, 0 }
   0xb   : > { %p41_p3 = scmp.ne.s32.totalorder %s876_s10, %s872_s9  ;;  %p42_p4 = scmp.eq.s32.totalorder %s930_s13, 0 }
   0xc   : > { %s946_s18 = scalar_select %p26_p1, %s880_s11, %s28_s16  }
   0xd   : > { %p948_p5 = por %p36_p2, %p35_p0  ;;  %p952_p6 = por %p42_p4, %p41_p3 }
   0xe   : > { %p91_p7 = scmp.eq.s32.totalorder %s930_s13, 1  ;;  %p97_p8 = scmp.eq.s32.totalorder %s661_s14, 1 }
   0xf   : > { %s1352_s20 = scalar_select %p952_p6, 1, 0 }
  0x10   : > { %p703_p10 = scmp.lt.s32.totalorder %s884_s12, 2  ;;  %p959_p11 = por %p91_p7, %p35_p0 }
  0x11   : > { %p963_p12 = por %p97_p8, %p41_p3  ;;  %s968_s23 = sand.u32 1, %s880_s11  }
  0x12   : > { %s1353_s21 = scalar_select %p959_p11, 1, 0 }
  0x13   : > { %s1354_s22 = scalar_select %p963_p12, 1, 0 }
  0x14   : > { %s678_s24 = sshll.u32 %s884_s12, 10  ;;  %s664_s25 = sshll.u32 %s968_s23, 6 }
  0x15   : > { %s977_s28 = scalar_lea.hbm %s1346_s0, %s678_s24  ;;  %s121_s29 = scalar_lea.vmem [#allocation2], %s664_s25 }
  0x16   : > { %s128_s30 = sshll.u32 %s121_s29, 4  ;;  %p983_p13 = pnand %p703_p10, %p948_p5  ;;  %s987_s30 = int_to_ptr.vmem [resolvable:$true] %s128_s30 }
  0x17   : > { %s118_s4 = scalar_lea.sflag [#allocation3], %s968_s23  ;;  %s754_s5 = scalar_lea.hbm %s977_s28, 1024 }
  0x18   : > { %p755_p0 = scmp.ne.s32.totalorder %s977_s28, %s754_s5  ;;  %p756_p1 = pneg %p983_p13 }
  0x19   : > { %s759_s8 = scalar_lea.hbm %s1346_s0, 2048  ;;  %p760_p4 = scmp.lt.u32.totalorder %s977_s28, %s1346_s0 }
  0x1a   : > { %p757_p2 = pnand %p756_p1, %p755_p0  ;;  %p761_p5 = scmp.lt.u32.totalorder %s759_s8, %s754_s5 }
  0x1b   : > { %p763_p8 = scmp.lt.u32.totalorder %s754_s5, %s977_s28 }
  0x1c   : > { %p758_p3 = pneg %p757_p2  ;;  %p762_p7 = por %p761_p5, %p760_p4 }
  0x1e   : > { %p764_p10 = por %p763_p8, %p762_p7 }
  0x20   : > { %p765_p9 = pnand %p764_p10, %p758_p3 }
  0x22   : > { %768 = shalt.err (!%p765_p9)
}
  0x23   : > { %s769_s17 = scalar_lea.vmem %s987_s30, 1024  ;;  %s886_s19 = smov [#allocation2]  }
  0x24   : > { %p770_p0 = scmp.ne.s32.totalorder %s987_s30, %s769_s17  ;;  %s774_s26 = sshll.u32 %s886_s19, 4  ;;  %s775_s26 = int_to_ptr.vmem [resolvable:$false] %s774_s26 }
  0x25   : > { %s776_s27 = scalar_lea.vmem %s775_s26, 2048  ;;  %p777_p11 = scmp.lt.s32.totalorder %s987_s30, %s775_s26 }
  0x26   : > { %p772_p2 = pnand %p770_p0, %p756_p1  ;;  %p778_p4 = scmp.lt.s32.totalorder %s776_s27, %s769_s17 }
  0x28   : > { %p773_p12 = pneg %p772_p2  ;;  %p779_p5 = por %p778_p4, %p777_p11 }
  0x2a   : > { %p780_p7 = pnand %p779_p5, %p773_p12 }
  0x2c   : > { %783 = shalt.err (!%p780_p7)
}
  0x2d   : > { %s887_s29 = smov 128   ;;  %s888_s5 = smov 8  }
  0x2e   : > { %695 = dma.hbm_to_vmem [thread:$0]  (!%p983_p13), %s977_s28, 1024, %s987_s30, %s118_s4, %s887_s29, %s887_s29, %s888_s5  }
  0x2f   : > { %p670_p9 = scmp.ge.s32.totalorder %s884_s12, 1  ;;  %p157_p11 = scmp.lt.s32.totalorder %s884_s12, 3 }
  0x30   : > { %s1031_s14 = scalar_lea.hbm %s1347_s1, %s678_s24  ;;  %s142_s16 = scalar_lea.vmem [#allocation5], %s664_s25 }
  0x31   : > { %p1022_p12 = pnand %p670_p9, %p157_p11  ;;  %s149_s17 = sshll.u32 %s142_s16, 4  ;;  %s1035_s17 = int_to_ptr.vmem [resolvable:$true] %s149_s17 }
  0x32   : > { %s139_s28 = scalar_lea.sflag [#allocation6], %s968_s23  ;;  %s784_s30 = scalar_lea.hbm %s1031_s14, 1024 }
  0x33   : > { %p785_p3 = scmp.ne.s32.totalorder %s1031_s14, %s784_s30  ;;  %s789_s24 = scalar_lea.hbm %s1347_s1, 2048 }
  0x34   : > { %p790_p0 = scmp.lt.u32.totalorder %s1031_s14, %s1347_s1  ;;  %p791_p2 = scmp.lt.u32.totalorder %s789_s24, %s784_s30 }
  0x35   : > { %p787_p8 = pnand %p785_p3, %p756_p1  ;;  %p793_p5 = scmp.lt.u32.totalorder %s784_s30, %s1031_s14 }
  0x36   : > { %p792_p4 = por %p791_p2, %p790_p0 }
  0x37   : > { %p788_p10 = pneg %p787_p8 }
  0x38   : > { %p794_p7 = por %p793_p5, %p792_p4 }
  0x3a   : > { %p795_p9 = pnand %p794_p7, %p788_p10 }
  0x3c   : > { %798 = shalt.err (!%p795_p9)
}
  0x3d   : > { %s799_s25 = scalar_lea.vmem %s1035_s17, 1024  ;;  %s889_s7 = smov [#allocation5]  }
  0x3e   : > { %p800_p11 = scmp.ne.s32.totalorder %s1035_s17, %s799_s25  ;;  %s804_s8 = sshll.u32 %s889_s7, 4  ;;  %s805_s8 = int_to_ptr.vmem [resolvable:$false] %s804_s8 }
  0x3f   : > { %s806_s16 = scalar_lea.vmem %s805_s8, 2048  ;;  %p807_p6 = scmp.lt.s32.totalorder %s1035_s17, %s805_s8 }
  0x40   : > { %p802_p3 = pnand %p800_p11, %p756_p1  ;;  %p808_p0 = scmp.lt.s32.totalorder %s806_s16, %s799_s25 }
  0x42   : > { %p803_p8 = pneg %p802_p3  ;;  %p809_p2 = por %p808_p0, %p807_p6 }
  0x44   : > { %p810_p4 = pnand %p809_p2, %p803_p8 }
  0x46   : > { %813 = shalt.err (!%p810_p4)
}
  0x47   : > { %698 = dma.hbm_to_vmem [thread:$0]  (!%p983_p13), %s1031_s14, 1024, %s1035_s17, %s139_s28, %s887_s29, %s887_s29, %s888_s5  }
  0x48   : > { %161 = sbr.rel (%p1022_p12) target bundleno = 703 (0x2bf), region = 28  ;;  %s1069_s30 = sand.u32 (!%p1022_p12), 1, %s876_s10  }
  0x49   : > { %s671_s4 = sshll.u32 (!%p1022_p12), %s1069_s30, 6  ;;  %s164_s19 = scalar_lea.sflag (!%p1022_p12), [#allocation3], %s1069_s30 }
  0x4a   : > { %s1073_s3 = scalar_lea.vmem (!%p1022_p12), [#allocation2], %s671_s4  ;;  %p1357_p6 = scmp.ne.s32.totalorder (!%p1022_p12), %s1352_s20, 0 }
  0x4f   : > { %859 = dma.done.wait (%p1357_p6), %s164_s19, 1024  }
  0x50   : > { %861 = vsyncadd (%p1357_p6), %s164_s19, 4294966272  ;;  %s173_s23 = scalar_lea.sflag [#allocation6], %s1069_s30  ;;  %s176_s29 = scalar_lea.vmem [#allocation5], %s671_s4 }
  0x51   : > { %863 = dma.done.wait (%p1357_p6), %s173_s23, 1024  }
  0x52   : > { %865 = vsyncadd (%p1357_p6), %s173_s23, 4294966272  ;;  %v202_v0 = vld [vmem:[%s1073_s3] sm:$0xff]  ;;  %v204_v2 = vld [vmem:[%s1073_s3 + $0x10] sm:$0xff]  ;;  %s890_s20 = smov 16   ;;  %s891_s5 = smov 1   ;;  %vm226_vm0 = vcmask 1047680   ;;  %v283_v61 = vlaneseq }
  0x53   : > { %v210_v1 = vld [vmem:[%s176_s29] sm:$0xff]  ;;  %v212_v4 = vld [vmem:[%s176_s29 + $0x10] sm:$0xff]  ;;  %v203_v5 = vld [vmem:[%s1073_s3 + $0x8] sm:$0xff]  ;;  %s892_s6 = smov 127   ;;  %vm348_vm1 = vcmask 138248   ;;  %vm387_vm3 = vcmask 130048  }
  0x54   : > { %v1086_v3 = vsub.f32 %v202_v0, %v210_v1  ;;  %v211_v6 = vld [vmem:[%s176_s29 + $0x8] sm:$0xff]  ;;  %v1089_v7 = vsub.f32 %v204_v2, %v212_v4  ;;  %v205_v8 = vld [vmem:[%s1073_s3 + $0x18] sm:$0xff]  ;;  %v206_v12 = vld [vmem:[%s1073_s3 + $0x20] sm:$0xff]  ;;  %s673_s14 = sshll.u32 %s1069_s30, 3  ;;  %s675_s24 = sshll.u32 %s930_s13, 7 }
  0x55   : > { %v213_v9 = vld [vmem:[%s176_s29 + $0x18] sm:$0xff]  ;;  %v1094_v10 = vsub.f32 %v203_v5, %v211_v6  ;;  %v214_v13 = vld [vmem:[%s176_s29 + $0x20] sm:$0xff]  ;;  %v207_v14 = vld [vmem:[%s1073_s3 + $0x28] sm:$0xff]  ;;  %s201_s27 = scalar_lea.vmem [#allocation7], %s673_s14  ;;  %s1302_s19 = scalar_lea.hbm %s1348_s2, %s675_s24 }
  0x56   : > { %227 = vrot.lane.b32.xlu0 %v1086_v3, %s890_s20  ;;  %233 = vrot.lane.b32.xlu1 %v1089_v7, %s890_s20  ;;  %v1098_v11 = vsub.f32 %v205_v8, %v213_v9  ;;  %v215_v15 = vld [vmem:[%s176_s29 + $0x28] sm:$0xff]  ;;  %v1104_v16 = vsub.f32 %v206_v12, %v214_v13  ;;  %v208_v18 = vld [vmem:[%s1073_s3 + $0x30] sm:$0xff]  ;;  %v1187_v12 = vshrl.u32 %v283_v61, 7  ;;  %s568_s25 = sshll.u32 %s201_s27, 4  ;;  %p1358_p1 = scmp.ne.s32.totalorder %s1353_s21, 0  ;;  %s1304_s25 = int_to_ptr.vmem [resolvable:$true] %s568_s25 }
  0x57   : > { %v1108_v17 = vsub.f32 %v207_v14, %v215_v15  ;;  %v216_v19 = vld [vmem:[%s176_s29 + $0x30] sm:$0xff]  ;;  %v209_v20 = vld [vmem:[%s1073_s3 + $0x38] sm:$0xff]  ;;  %s555_s3 = scalar_lea.sflag [#allocation4], %s1069_s30  ;;  %s814_s23 = scalar_lea.vmem %s1304_s25, 128 }
  0x58   : > { %v217_v21 = vld [vmem:[%s176_s29 + $0x38] sm:$0xff]  ;;  %v1114_v22 = vsub.f32 %v208_v18, %v216_v19  ;;  %vm285_vm2 = vcmp.lt.s32.totalorder %v1187_v12, 7  ;;  %p815_p13 = scmp.ne.s32.totalorder %s1304_s25, %s814_s23  ;;  %s893_s13 = smov [#allocation7]  }
  0x59   : > { %v1118_v23 = vsub.f32 %v209_v20, %v217_v21  ;;  %s818_s29 = sshll.u32 %s893_s13, 4  ;;  %s819_s29 = int_to_ptr.vmem [resolvable:$false] %s818_s29 }
  0x5a   : > { %230 = vrot.lane.b32.xlu0 %v1094_v10, %s890_s20  ;;  %236 = vrot.lane.b32.xlu1 %v1098_v11, %s890_s20  ;;  %p816_p12 = pnand %p815_p13, %p1358_p1  ;;  %p821_p5 = scmp.lt.s32.totalorder %s1304_s25, %s819_s29 }
  0x5c   : > { %p817_p10 = pneg %p816_p12 }
  0x5e   : > { %239 = vrot.lane.b32.xlu0 %v1104_v16, %s890_s20  ;;  %242 = vrot.lane.b32.xlu1 %v1108_v17, %s890_s20 }
  0x62   : > { %245 = vrot.lane.b32.xlu0 %v1114_v22, %s890_s20  ;;  %248 = vrot.lane.b32.xlu1 %v1118_v23, %s890_s20 }
  0x66   : > { %308 = vrot.lane.b32.xlu0 %v1086_v3, %s891_s5  ;;  %310 = vrot.lane.b32.xlu1 %v1094_v10, %s891_s5 }
  0x6a   : > { %312 = vrot.lane.b32.xlu0 %v1089_v7, %s891_s5  ;;  %314 = vrot.lane.b32.xlu1 %v1098_v11, %s891_s5 }
  0x6e   : > { %316 = vrot.lane.b32.xlu0 %v1104_v16, %s891_s5  ;;  %318 = vrot.lane.b32.xlu1 %v1108_v17, %s891_s5 }
  0xc8   : > { %v228_v24 = vpop.permute.xlu0 %227  ;;  %v234_v26 = vpop.permute.xlu1 %233 }
  0xc9   : > { %v229_v25 = vsel %vm226_vm0, %v228_v24, %v1086_v3  ;;  %v235_v27 = vsel %vm226_vm0, %v234_v26, %v1089_v7  ;;  %v279_v26 = vrot.slane %v1094_v10, 1 }
  0xca   : > { %251 = vrot.lane.b32.xlu0 %v229_v25, %s890_s20 }
  0xcc   : > { %v231_v28 = vpop.permute.xlu0 %230  ;;  %v237_v30 = vpop.permute.xlu1 %236 }
  0xcd   : > { %v232_v29 = vsel %vm226_vm0, %v231_v28, %v1094_v10  ;;  %v238_v31 = vsel %vm226_vm0, %v237_v30, %v1098_v11  ;;  %v276_v30 = vrot.slane %v1089_v7, 1 }
  0xce   : > { %255 = vrot.lane.b32.xlu0 %v235_v27, %s890_s20  ;;  %253 = vrot.lane.b32.xlu1 %v232_v29, %s890_s20  ;;  %v275_v27 = vrot.slane %v1086_v3, 1 }
  0xd0   : > { %v240_v32 = vpop.permute.xlu0 %239  ;;  %v243_v34 = vpop.permute.xlu1 %242 }
  0xd1   : > { %v241_v33 = vsel %vm226_vm0, %v240_v32, %v1104_v16  ;;  %v244_v35 = vsel %vm226_vm0, %v243_v34, %v1108_v17  ;;  %v280_v34 = vrot.slane %v1098_v11, 1 }
  0xd2   : > { %257 = vrot.lane.b32.xlu1 %v238_v31, %s890_s20  ;;  %259 = vrot.lane.b32.xlu0 %v241_v33, %s890_s20  ;;  %v1201_v33 = vsel %vm285_vm2, %v279_v26, %v275_v27 }
  0xd4   : > { %v246_v36 = vpop.permute.xlu0 %245  ;;  %v249_v38 = vpop.permute.xlu1 %248 }
  0xd5   : > { %v247_v37 = vsel %vm226_vm0, %v246_v36, %v1114_v22  ;;  %v250_v39 = vsel %vm226_vm0, %v249_v38, %v1118_v23 }
  0xd6   : > { %261 = vrot.lane.b32.xlu1 %v244_v35, %s890_s20  ;;  %263 = vrot.lane.b32.xlu0 %v247_v37, %s890_s20  ;;  %v277_v35 = vrot.slane %v1104_v16, 1 }
  0xd8   : > { %v309_v40 = vpop.permute.xlu0 %308  ;;  %v311_v41 = vpop.permute.xlu1 %310 }
  0xda   : > { %265 = vrot.lane.b32.xlu1 %v250_v39, %s890_s20  ;;  %320 = vrot.lane.b32.xlu0 %v1114_v22, %s891_s5  ;;  %s820_s20 = scalar_lea.vmem %s819_s29, 256 }
  0xdb   : > { %p822_p7 = scmp.lt.s32.totalorder %s820_s20, %s814_s23 }
  0xdc   : > { %v313_v42 = vpop.permute.xlu0 %312  ;;  %v315_v43 = vpop.permute.xlu1 %314 }
  0xdd   : > { %p823_p9 = por %p822_p7, %p821_p5 }
  0xde   : > { %322 = vrot.lane.b32.xlu1 %v1118_v23, %s891_s5 }
  0xdf   : > { %p824_p11 = pnand %p823_p9, %p817_p10 }
  0xe0   : > { %v317_v44 = vpop.permute.xlu0 %316  ;;  %v319_v45 = vpop.permute.xlu1 %318 }
 0x13c   : > { %v252_v46 = vpop.permute.xlu0 %251 }
 0x13d   : > { %v267_v47 = vsel %vm226_vm0, %v252_v46, %v1086_v3 }
 0x13e   : > { %467 = vrot.lane.b32.xlu0 %v267_v47, %s892_s6  ;;  %v332_v53 = vsub.f32 %v267_v47, %v309_v40 }
 0x140   : > { %v254_v48 = vpop.permute.xlu1 %253  ;;  %v256_v49 = vpop.permute.xlu0 %255  ;;  %v340_v62 = vmul.f32 %v332_v53, %v332_v53  ;;  %v278_v53 = vrot.slane %v1114_v22, 1 }
 0x141   : > { %v268_v50 = vsel %vm226_vm0, %v254_v48, %v1094_v10  ;;  %v269_v51 = vsel %vm226_vm0, %v256_v49, %v1089_v7  ;;  %v1219_v48 = vsel %vm285_vm2, %v275_v27, %v279_v26 }
 0x142   : > { %469 = vrot.lane.b32.xlu1 %v268_v50, %s892_s6  ;;  %471 = vrot.lane.b32.xlu0 %v269_v51, %s892_s6  ;;  %v334_v52 = vsub.f32 %v269_v51, %v313_v42  ;;  %v333_v63 = vsub.f32 %v268_v50, %v311_v41  ;;  %v349_v13 = vsel %vm348_vm1, %v340_v62, 0.0  ;;  %v1210_v42 = vsel %vm285_vm2, %v280_v34, %v276_v30 }
 0x143   : > { %v403_v46 = vsub.f32 %v1210_v42, %v1098_v11  ;;  %v400_v51 = vsub.f32 %v1219_v48, %v1086_v3 }
 0x144   : > { %v258_v54 = vpop.permute.xlu1 %257  ;;  %v260_v55 = vpop.permute.xlu0 %259  ;;  %v342_v59 = vmul.f32 %v334_v52, %v334_v52  ;;  %v341_v14 = vmul.f32 %v333_v63, %v333_v63 }
 0x145   : > { %v270_v56 = vsel %vm226_vm0, %v258_v54, %v1098_v11  ;;  %v271_v57 = vsel %vm226_vm0, %v260_v55, %v1104_v16  ;;  %v282_v54 = vrot.slane %v1118_v23, 1 }
 0x146   : > { %473 = vrot.lane.b32.xlu1 %v270_v56, %s892_s6  ;;  %475 = vrot.lane.b32.xlu0 %v271_v57, %s892_s6  ;;  %v336_v58 = vsub.f32 %v271_v57, %v317_v44  ;;  %v335_v60 = vsub.f32 %v270_v56, %v315_v43  ;;  %v350_v8 = vsel %vm348_vm1, %v342_v59, 0.0  ;;  %v356_v36 = vsel %vm348_vm1, %v341_v14, 0.0 }
 0x147   : > { %v351_v25 = vadd.f32 %v350_v8, %v349_v13  ;;  %v281_v43 = vrot.slane %v1108_v17, 1  ;;  %v411_v56 = vmul.f32 %v403_v46, %v403_v46  ;;  %v1240_v3 = vsel %vm285_vm2, %v282_v54, %v278_v53 }
 0x148   : > { %v262_v0 = vpop.permute.xlu1 %261  ;;  %v264_v1 = vpop.permute.xlu0 %263  ;;  %v344_v2 = vmul.f32 %v336_v58, %v336_v58  ;;  %v343_v9 = vmul.f32 %v335_v60, %v335_v60  ;;  %v408_v58 = vmul.f32 %v400_v51, %v400_v51 }
 0x149   : > { %v272_v4 = vsel %vm226_vm0, %v262_v0, %v1108_v17  ;;  %v273_v5 = vsel %vm226_vm0, %v264_v1, %v1114_v22  ;;  %v1223_v49 = vsel %vm285_vm2, %v281_v43, %v277_v35  ;;  %v1244_v59 = vsel %vm285_vm2, %v277_v35, %v281_v43 }
 0x14a   : > { %477 = vrot.lane.b32.xlu1 %v272_v4, %s892_s6  ;;  %v337_v6 = vsub.f32 %v272_v4, %v319_v45  ;;  %479 = vrot.lane.b32.xlu0 %v273_v5, %s892_s6  ;;  %v352_v19 = vsel %vm348_vm1, %v344_v2, 0.0  ;;  %v357_v28 = vsel %vm348_vm1, %v343_v9, 0.0  ;;  %v401_v45 = vsub.f32 %v1201_v33, %v1094_v10 }
 0x14b   : > { %v353_v31 = vadd.f32 %v352_v19, %v351_v25  ;;  %v358_v40 = vadd.f32 %v357_v28, %v356_v36  ;;  %v1230_v10 = vsel %vm285_vm2, %v276_v30, %v280_v34  ;;  %v405_v57 = vsub.f32 %v1223_v49, %v1108_v17 }
 0x14c   : > { %v266_v15 = vpop.permute.xlu1 %265  ;;  %v321_v18 = vpop.permute.xlu0 %320  ;;  %v345_v20 = vmul.f32 %v337_v6, %v337_v6  ;;  %v402_v52 = vsub.f32 %v1230_v10, %v1089_v7  ;;  %v409_v55 = vmul.f32 %v401_v45, %v401_v45  ;;  %v404_v60 = vsub.f32 %v1244_v59, %v1104_v16 }
 0x14d   : > { %v338_v21 = vsub.f32 %v273_v5, %v321_v18  ;;  %v274_v24 = vsel %vm226_vm0, %v266_v15, %v1118_v23  ;;  %v424_v63 = vsel %vm387_vm3, %v411_v56, 0.0  ;;  %v413_v17 = vmul.f32 %v405_v57, %v405_v57 }
 0x14e   : > { %481 = vrot.lane.b32.xlu1 %v274_v24, %s892_s6  ;;  %v359_v37 = vsel %vm348_vm1, %v345_v20, 0.0  ;;  %v410_v7 = vmul.f32 %v402_v52, %v402_v52  ;;  %v423_v62 = vsel %vm387_vm3, %v409_v55, 0.0  ;;  %v407_v0 = vsub.f32 %v1240_v3, %v1118_v23 }
 0x14f   : > { %v346_v29 = vmul.f32 %v338_v21, %v338_v21  ;;  %v360_v47 = vadd.f32 %v359_v37, %v358_v40  ;;  %v416_v1 = vsel %vm387_vm3, %v408_v58, 0.0  ;;  %v1255_v2 = vsel %vm285_vm2, %v278_v53, %v282_v54 }
 0x150   : > { %v323_v32 = vpop.permute.xlu1 %322  ;;  %v417_v5 = vsel %vm387_vm3, %v410_v7, 0.0  ;;  %v425_v6 = vadd.f32 %v424_v63, %v423_v62  ;;  %v412_v8 = vmul.f32 %v404_v60, %v404_v60  ;;  %v406_v16 = vsub.f32 %v1255_v2, %v1114_v22 }
 0x151   : > { %v354_v38 = vsel %vm348_vm1, %v346_v29, 0.0  ;;  %v339_v39 = vsub.f32 %v274_v24, %v323_v32  ;;  %v426_v13 = vsel %vm387_vm3, %v413_v17, 0.0  ;;  %v415_v14 = vmul.f32 %v407_v0, %v407_v0 }
 0x152   : > { %v355_v41 = vadd.f32 %v354_v38, %v353_v31  ;;  %v418_v18 = vadd.f32 %v417_v5, %v416_v1  ;;  %v419_v21 = vsel %vm387_vm3, %v412_v8, 0.0  ;;  %v427_v24 = vadd.f32 %v426_v13, %v425_v6 }
 0x153   : > { %v347_v44 = vmul.f32 %v339_v39, %v339_v39  ;;  %v414_v25 = vmul.f32 %v406_v16, %v406_v16  ;;  %v428_v22 = vsel %vm387_vm3, %v415_v14, 0.0  ;;  %v1267_v38 = vadd.s32 8, %v1187_v12 }
 0x154   : > { %742 = vrsqrt.f32 %v355_v41  ;;  %vm365_vm4 = vcmp.eq.f32.partialorder %v355_v41, inf  ;;  %v368_v23 = vand.u32 2147483648, %v355_v41  ;;  %vm367_vm5 = vcmp.eq.f32.partialorder %v355_v41, 0.0 }
 0x155   : > { %v361_v50 = vsel %vm348_vm1, %v347_v44, 0.0  ;;  %v420_v29 = vadd.f32 %v419_v21, %v418_v18  ;;  %v421_v31 = vsel %vm387_vm3, %v414_v25, 0.0  ;;  %v429_v32 = vadd.f32 %v428_v22, %v427_v24 }
 0x156   : > { %v362_v11 = vadd.f32 %v361_v50, %v360_v47  ;;  %vm299_vm11 = vcmp.lt.s32.totalorder %v1267_v38, 15 }
 0x157   : > { %v422_v34 = vadd.f32 %v421_v31, %v420_v29  ;;  %vm439_vm8 = vcmp.eq.f32.partialorder %v429_v32, inf  ;;  %v442_v40 = vand.u32 2147483648, %v429_v32  ;;  %vm441_vm10 = vcmp.eq.f32.partialorder %v429_v32, 0.0 }
 0x158   : > { %744 = vrsqrt.f32 %v362_v11  ;;  %vm372_vm6 = vcmp.eq.f32.partialorder %v362_v11, inf  ;;  %v375_v27 = vand.u32 2147483648, %v362_v11  ;;  %vm374_vm7 = vcmp.eq.f32.partialorder %v362_v11, 0.0 }
 0x159   : > { %746 = vrsqrt.f32 %v429_v32  ;;  %vm432_vm9 = vcmp.eq.f32.partialorder %v422_v34, inf  ;;  %v435_v43 = vand.u32 2147483648, %v422_v34  ;;  %vm434_vm12 = vcmp.eq.f32.partialorder %v422_v34, 0.0 }
 0x15a   : > { %748 = vrsqrt.f32 %v422_v34 }
 0x15e   : > { %v743_v4 = vpop.eup %742 }
 0x15f   : > { %v364_v9 = vmul.f32 %v743_v4, %v355_v41 }
 0x161   : > { %v366_v15 = vsel %vm365_vm4, %v355_v41, %v364_v9 }
 0x162   : > { %v745_v19 = vpop.eup %744  ;;  %v369_v20 = vsel %vm367_vm5, %v368_v23, %v366_v15 }
 0x163   : > { %379 = vrot.lane.b32.xlu0 %v369_v20, %s892_s6  ;;  %v371_v26 = vmul.f32 %v745_v19, %v362_v11  ;;  %v747_v35 = vpop.eup %746 }
 0x164   : > { %v749_v36 = vpop.eup %748  ;;  %v438_v37 = vmul.f32 %v747_v35, %v429_v32 }
 0x165   : > { %v373_v28 = vsel %vm372_vm6, %v362_v11, %v371_v26  ;;  %v431_v39 = vmul.f32 %v749_v36, %v422_v34 }
 0x166   : > { %v376_v30 = vsel %vm374_vm7, %v375_v27, %v373_v28  ;;  %v440_v41 = vsel %vm439_vm8, %v429_v32, %v438_v37  ;;  %v295_v27 = vand.u32 127, %v283_v61 }
 0x167   : > { %381 = vrot.lane.b32.xlu1 %v376_v30, %s892_s6  ;;  %v433_v44 = vsel %vm432_vm9, %v422_v34, %v431_v39  ;;  %v443_v45 = vsel %vm441_vm10, %v442_v40, %v440_v41 }
 0x168   : > { %v436_v46 = vsel %vm434_vm12, %v435_v43, %v433_v44  ;;  %v445_v47 = vsel %vm299_vm11, %v443_v45, 0.0  ;;  %vm297_vm15 = vcmp.lt.s32.totalorder %v295_v27, 15 }
 0x169   : > { %v446_v50 = vsel %vm387_vm3, %v436_v46, 0.0  ;;  %v447_v12 = vsel %vm387_vm3, %v445_v47, 0.0  ;;  %vm500_vm1 = vmand %vm299_vm11, %vm297_vm15 }
 0x16a   : > { %v448_v51 = vadd.f32 %v447_v12, %v446_v50 }
 0x18b   : > { %449 = vadd.xlane.f32.xlu1 %v448_v51 }
 0x1b0   : > { %v468_v11 = vpop.permute.xlu0 %467 }
 0x1b1   : > { %v491_v52 = vsub.f32 %v1219_v48, %v468_v11 }
 0x1b3   : > { %v501_v57 = vmul.f32 %v491_v52, %v491_v52 }
 0x1b4   : > { %v470_v53 = vpop.permute.xlu1 %469  ;;  %v472_v54 = vpop.permute.xlu0 %471 }
 0x1b5   : > { %v493_v55 = vsub.f32 %v1230_v10, %v472_v54  ;;  %v492_v60 = vsub.f32 %v1201_v33, %v470_v53  ;;  %v509_v48 = vsel %vm387_vm3, %v501_v57, 0.0 }
 0x1b7   : > { %v503_v56 = vmul.f32 %v493_v55, %v493_v55  ;;  %v502_v6 = vmul.f32 %v492_v60, %v492_v60 }
 0x1b8   : > { %v474_v58 = vpop.permute.xlu1 %473  ;;  %v476_v7 = vpop.permute.xlu0 %475 }
 0x1b9   : > { %v494_v62 = vsub.f32 %v1210_v42, %v474_v58  ;;  %v495_v63 = vsub.f32 %v1244_v59, %v476_v7  ;;  %v510_v17 = vsel %vm387_vm3, %v503_v56, 0.0  ;;  %v516_v23 = vsel %vm387_vm3, %v502_v6, 0.0 }
 0x1ba   : > { %v511_v33 = vadd.f32 %v510_v17, %v509_v48 }
 0x1bb   : > { %v504_v0 = vmul.f32 %v494_v62, %v494_v62  ;;  %v505_v1 = vmul.f32 %v495_v63, %v495_v63 }
 0x1bc   : > { %v478_v4 = vpop.permute.xlu1 %477  ;;  %v480_v5 = vpop.permute.xlu0 %479 }
 0x1bd   : > { %v512_v10 = vsel %vm387_vm3, %v505_v1, 0.0  ;;  %v496_v8 = vsub.f32 %v1223_v49, %v478_v4  ;;  %v497_v16 = vsub.f32 %v1255_v2, %v480_v5  ;;  %v517_v42 = vsel %vm387_vm3, %v504_v0, 0.0 }
 0x1be   : > { %v513_v13 = vadd.f32 %v512_v10, %v511_v33  ;;  %v518_v20 = vadd.f32 %v517_v42, %v516_v23 }
 0x1bf   : > { %v506_v9 = vmul.f32 %v496_v8, %v496_v8  ;;  %v507_v59 = vmul.f32 %v497_v16, %v497_v16 }
 0x1c0   : > { %v482_v14 = vpop.permute.xlu1 %481 }
 0x1c1   : > { %v519_v15 = vsel %vm387_vm3, %v506_v9, 0.0  ;;  %v514_v18 = vsel %vm387_vm3, %v507_v59, 0.0  ;;  %v498_v19 = vsub.f32 %v1240_v3, %v482_v14 }
 0x1c2   : > { %v515_v21 = vadd.f32 %v514_v18, %v513_v13  ;;  %v520_v24 = vadd.f32 %v519_v15, %v518_v20 }
 0x1c3   : > { %v508_v49 = vmul.f32 %v498_v19, %v498_v19 }
 0x1c4   : > { %750 = vrsqrt.f32 %v515_v21  ;;  %vm525_vm14 = vcmp.eq.f32.partialorder %v515_v21, inf  ;;  %v528_v34 = vand.u32 2147483648, %v515_v21  ;;  %vm527_vm2 = vcmp.eq.f32.partialorder %v515_v21, 0.0 }
 0x1c5   : > { %v521_v2 = vsel %vm387_vm3, %v508_v49, 0.0 }
 0x1c6   : > { %v522_v25 = vadd.f32 %v521_v2, %v520_v24 }
 0x1c8   : > { %752 = vrsqrt.f32 %v522_v25  ;;  %vm532_vm13 = vcmp.eq.f32.partialorder %v522_v25, inf  ;;  %v535_v3 = vand.u32 2147483648, %v522_v25  ;;  %vm534_vm0 = vcmp.eq.f32.partialorder %v522_v25, 0.0 }
 0x1ce   : > { %v751_v26 = vpop.eup %750 }
 0x1cf   : > { %v524_v28 = vmul.f32 %v751_v26, %v515_v21 }
 0x1d1   : > { %v526_v32 = vsel %vm525_vm14, %v515_v21, %v524_v28 }
 0x1d2   : > { %v753_v22 = vpop.eup %752  ;;  %v529_v39 = vsel %vm527_vm2, %v528_v34, %v526_v32 }
 0x1d3   : > { %v531_v29 = vmul.f32 %v753_v22, %v522_v25  ;;  %v537_v45 = vsel %vm297_vm15, %v529_v39, 0.0 }
 0x1d4   : > { %v539_v38 = vsel %vm387_vm3, %v537_v45, 0.0 }
 0x1d5   : > { %v380_v30 = vpop.permute.xlu0 %379  ;;  %v533_v31 = vsel %vm532_vm13, %v522_v25, %v531_v29 }
 0x1d6   : > { %v536_v35 = vsel %vm534_vm0, %v535_v3, %v533_v31  ;;  %v385_v36 = vsel %vm297_vm15, %v380_v30, 0.0 }
 0x1d7   : > { %v538_v40 = vsel %vm500_vm1, %v536_v35, 0.0  ;;  %v388_v41 = vsel %vm387_vm3, %v385_v36, 0.0 }
 0x1d8   : > { %v540_v46 = vsel %vm387_vm3, %v538_v40, 0.0 }
 0x1d9   : > { %v382_v37 = vpop.permute.xlu1 %381  ;;  %v541_v47 = vadd.f32 %v540_v46, %v539_v38 }
 0x1da   : > { %v386_v61 = vsel %vm297_vm15, %v382_v37, 0.0 }
 0x1db   : > { %v389_v43 = vsel %vm387_vm3, %v386_v61, 0.0 }
 0x1dc   : > { %v390_v44 = vadd.f32 %v389_v43, %v388_v41 }
 0x1de   : > { %391 = vadd.xlane.f32.xlu0 %v390_v44 }
 0x1e2   : > { %542 = vadd.xlane.f32.xlu0 %v541_v47 }
 0x218   : > { %v450_v50 = vpop.xlane.xlu1 %449 }
 0x219   : > { %v451_v12 = vrot.slane %v450_v50, 4 }
 0x21b   : > { %v452_v51 = vadd.f32 %v451_v12, %v450_v50 }
 0x21d   : > { %v453_v11 = vrot.slane %v452_v51, 2 }
 0x21f   : > { %v454_v55 = vadd.f32 %v453_v11, %v452_v51 }
 0x221   : > { %v455_v62 = vrot.slane %v454_v55, 1 }
 0x223   : > { %v456_v48 = vadd.f32 %v455_v62, %v454_v55 }
 0x26b   : > { %v392_v52 = vpop.xlane.xlu0 %391 }
 0x26c   : > { %v393_v53 = vrot.slane %v392_v52, 4 }
 0x26e   : > { %v394_v54 = vadd.f32 %v393_v53, %v392_v52 }
 0x26f   : > { %v543_v56 = vpop.xlane.xlu0 %542 }
 0x270   : > { %v395_v57 = vrot.slane %v394_v54, 2  ;;  %v544_v58 = vrot.slane %v543_v56, 4 }
 0x272   : > { %v545_v7 = vadd.f32 %v544_v58, %v543_v56  ;;  %v396_v60 = vadd.f32 %v395_v57, %v394_v54 }
 0x274   : > { %v546_v63 = vrot.slane %v545_v7, 2  ;;  %v397_v17 = vrot.slane %v396_v60, 1 }
 0x276   : > { %v547_v0 = vadd.f32 %v546_v63, %v545_v7  ;;  %v398_v1 = vadd.f32 %v397_v17, %v396_v60 }
 0x278   : > { %680 = vpush %v398_v1  ;;  %v548_v4 = vrot.slane %v547_v0, 1 }
 0x279   : > { %682 = vpush %v456_v48 }
 0x27a   : > { %v549_v5 = vadd.f32 %v548_v4, %v547_v0 }
 0x27c   : > { %684 = vpush %v549_v5 }
 0x2a9   : > { %s681_s17 = spop %680 }
 0x2aa   : > { %s683_s28 = spop %682 }
 0x2ab   : > { %s458_s26 = sadd.f32 %s683_s28, %s681_s17 }
 0x2ad   : > { %s685_s7 = spop %684 }
 0x2ae   : > { %s551_s8 = sadd.f32 %s685_s7, %s458_s26 }
 0x2b0   : > { %v552_v6 = vstv %s551_s8 }
 0x2b1   : > { %553 = vst [vmem:[%s201_s27] sm:$0xff] %v552_v6 }
 0x2b2   : > { %827 = shalt.err (!%p824_p11)
}
 0x2b3   : > { %s828_s30 = scalar_lea.hbm %s1302_s19, 128  ;;  %s832_s14 = scalar_lea.hbm %s1348_s2, 256 }
 0x2b4   : > { %p829_p3 = scmp.ne.s32.totalorder %s1302_s19, %s828_s30  ;;  %p833_p2 = scmp.lt.u32.totalorder %s1302_s19, %s1348_s2 }
 0x2b5   : > { %p834_p4 = scmp.lt.u32.totalorder %s832_s14, %s828_s30  ;;  %p836_p13 = scmp.lt.u32.totalorder %s828_s30, %s1302_s19 }
 0x2b6   : > { %p830_p8 = pnand %p829_p3, %p1358_p1 }
 0x2b7   : > { %p835_p6 = por %p834_p4, %p833_p2 }
 0x2b8   : > { %p831_p0 = pneg %p830_p8 }
 0x2b9   : > { %p837_p12 = por %p836_p13, %p835_p6 }
 0x2bb   : > { %p838_p10 = pnand %p837_p12, %p831_p0 }
 0x2bd   : > { %841 = shalt.err (!%p838_p10)
}
 0x2be   : > { %690 = dma.vmem_to_hbm [thread:$0]  (%p1358_p1), %s1304_s25, 128, %s1302_s19, %s555_s3  }
 0x2bf PF: > { %s580_s24 = sand.u32 1, %s872_s9   ;;  %p1359_p5 = scmp.ne.s32.totalorder %s1354_s22, 0 }
 0x2c0   : > { %p1360_p7 = scmp.ge.s32.totalorder %s884_s12, 2  ;;  %s581_s26 = scalar_lea.sflag [#allocation4], %s580_s24 }
 0x2c2   : > { %p700_p9 = pnand %p1360_p7, %p1359_p5 }
 0x2c4   : > { %867 = dma.done.wait (!%p700_p9), %s581_s26, 128  }
 0x2c5   : > { %869 = vsyncadd (!%p700_p9), %s581_s26, 4294967168  ;;  %p18_p11 = scmp.ge.s32.totalorder %s934_s15, 4   ;;  %s1361_s9 = smov %s876_s10 }
 0x2c6   : > { %s1362_s10 = smov %s880_s11  ;;  %s1363_s11 = smov %s946_s18 }
 0x2c7   : > { %s1364_s12 = smov %s934_s15  ;;  %20 = sbr.rel (!%p18_p11) target bundleno = 7 (0x7), region = 86 }
 0x2ce   :  { %586 = vsyncpa [#allocation3], 1 }
 0x2cf   :  { %588 = vsyncpa [#allocation3 + $0x1], 1 }
 0x2d0   :  { %589 = vsyncpa [#allocation6], 1 }
 0x2d1   :  { %591 = vsyncpa [#allocation6 + $0x1], 1 }
 0x2d2   :  { %592 = vsyncpa [#allocation4], 1 }
 0x2d3   :  { %594 = vsyncpa [#allocation4 + $0x1], 1 }

</bundles_post_ra>
